<compile_context>
chip_gen: v5e
topology: v5e:2x2
jax: 0.10.0
libtpu: 0.0.40
codegen_flags: <defaults>
</compile_context>

<pallas_src>
import functools

import jax
import jax.numpy as jnp
from jax.experimental import pallas as pl
from jax.experimental.pallas import tpu as pltpu

LANE = 128   # TPU lane width; output/feature lanes are padded to this.
HALF = 64    # self features in lanes [0, 64), aggregated features in [64, 128).


def sage_kernel(a_ref, x_ref, w_ref, o_ref):
    """Fused 2-layer SAGEConv('mean') forward.

    a_ref: (N, N)        bf16  row-normalized in-adjacency (mean aggregation)
    x_ref: (N, 128)      bf16  features in lanes [0, in_size), ones at lane in_size
    w_ref: (2, 128, 128) bf16  per-layer [W_self ; W_neigh] stacked in row halves,
                               biases folded into the self rows via the ones column
    o_ref: (N, 128)      f32   layer-2 output in lanes [0, out_size)
    """
    a = a_ref[...]
    x = x_ref[...]

    # Layer 0: mean-aggregate neighbors, pack [x | A@x] into one 128-lane operand
    # (both halves are zero where the other is nonzero), single fused matmul
    # against [W_self1 ; W_neigh1] with b1 folded into row `in_size`.
    ax = jnp.dot(a, x, preferred_element_type=jnp.float32)
    comb0 = (x.astype(jnp.float32) + pltpu.roll(ax, HALF, axis=1)).astype(jnp.bfloat16)
    h1 = jnp.maximum(
        jnp.dot(comb0, w_ref[0], preferred_element_type=jnp.float32), 0.0
    )  # ReLU; dropout p=0 -> identity.  h1[:, hid] == relu(1.0) == 1.0 (ones column).

    # Layer 1 (last layer): same fused pattern, no activation; b2 folded into
    # w_ref[1] row `hid` and picked up by the carried ones column of h1.
    h1b = h1.astype(jnp.bfloat16)
    ah1 = jnp.dot(a, h1b, preferred_element_type=jnp.float32)
    comb1 = (h1 + pltpu.roll(ah1, HALF, axis=1)).astype(jnp.bfloat16)
    o_ref[...] = jnp.dot(comb1, w_ref[1], preferred_element_type=jnp.float32)


def prepare_sage_params(ws1, b1, wn1, ws2, b2, wn2):
    """One-time (init-time) padding/folding of SAGEConv parameters.

    Layout per layer (128, 128):
      rows [0, 64)   : W_self (bias folded into row `in_dim` via the ones column)
      rows [64, 128) : W_neigh
    Layer 0 additionally sets row `in_size`, column `hid` to 1.0 so the ones
    column propagates into h1[:, hid] and layer 1 can fold b2 the same way.
    """
    in_size, hid = ws1.shape
    out_size = ws2.shape[1]
    # Spare-lane requirements of the fused [self | neigh] layout + bias folding.
    assert in_size + 1 <= HALF, "need a spare lane for the ones/bias column"
    assert hid + 1 <= HALF, "need a spare lane for the carried ones column"
    assert out_size <= LANE

    w1 = jnp.zeros((LANE, LANE), jnp.float32)
    w1 = w1.at[:in_size, :hid].set(ws1)
    w1 = w1.at[in_size, :hid].set(b1)        # b1 via x ones column
    w1 = w1.at[in_size, hid].set(1.0)        # carry ones column -> h1[:, hid] = 1
    w1 = w1.at[HALF:HALF + in_size, :hid].set(wn1)

    w2 = jnp.zeros((LANE, LANE), jnp.float32)
    w2 = w2.at[:hid, :out_size].set(ws2)
    w2 = w2.at[hid, :out_size].set(b2)       # b2 via h1 ones column
    w2 = w2.at[HALF:HALF + hid, :out_size].set(wn2)

    w_fused = jnp.stack([w1, w2]).astype(jnp.bfloat16)

    # The aggregated ones column (A_mean @ 1, i.e. degree-dependent) lands on
    # these neighbor-path rows; they must be exactly zero or the biases would be
    # silently double-counted with a degree-dependent weight.
    assert not bool(jnp.any(w_fused[0, HALF + in_size, :]))
    assert not bool(jnp.any(w_fused[1, HALF + hid, :]))
    return w_fused


@functools.partial(jax.jit, static_argnames=("in_size", "out_size"))
def sage_forward(a_mean, x, w_fused, *, in_size, out_size):
    n = x.shape[0]

    # Per-call prep only: lane-pad features to 128 with a constant-ones bias
    # column and cast the MXU operands to bf16 (accumulation stays f32).
    x_p = (jnp.zeros((n, LANE), jnp.float32)
           .at[:, :in_size].set(x)
           .at[:, in_size].set(1.0)
           .astype(jnp.bfloat16))
    a_b = a_mean.astype(jnp.bfloat16)

    # Advisory cost hint (padded-shape arithmetic, bf16 inputs, f32 output).
    flops = 2 * (2 * n * n * LANE) + 2 * (2 * n * LANE * LANE)
    bytes_accessed = 2 * (n * n + n * LANE + 2 * LANE * LANE) + 4 * n * LANE
    cost = pl.CostEstimate(flops=flops, transcendentals=0, bytes_accessed=bytes_accessed)

    # Tiny problem (N=32): single invocation, everything resident in VMEM.
    # TODO(synk): large-N path needs a (dst_tiles, src_tiles) grid with the src
    # (reduction) axis last, f32 (tm, 128) VMEM accumulator with pl.when
    # init/finalize, dimension_semantics=("parallel", "arbitrary"), tk>=256 on
    # v6e, and an explicit vmem_limit_bytes; note v7x only has 64 MiB VMEM so the
    # whole-array-resident A_mean ceiling is ~half of v5e/v6e.
    vmem = pl.BlockSpec(memory_space=pltpu.MemorySpace.VMEM)
    out_p = pl.pallas_call(
        sage_kernel,
        out_shape=jax.ShapeDtypeStruct((n, LANE), jnp.float32),
        in_specs=[vmem, vmem, vmem],
        out_specs=vmem,
        cost_estimate=cost,
    )(a_b, x_p, w_fused)
    return out_p[:, :out_size]


def build_mean_adjacency(key, n_nodes, edge_prob=0.15):
    """Deterministic random directed graph -> DGL SAGEConv 'mean' aggregation matrix."""
    adj = (jax.random.uniform(key, (n_nodes, n_nodes)) < edge_prob).astype(jnp.float32)
    # adj[d, s] = 1 if edge s -> d ; isolated nodes get a zero row (mean of empty set = 0).
    in_deg = jnp.maximum(adj.sum(axis=1), 1.0)
    return adj / in_deg[:, None]


def sage_reference_f32(a, x, ws1, b1, wn1, ws2, b2, wn2):
    """Exact f32 module semantics."""
    h1 = jnp.maximum(x @ ws1 + (a @ x) @ wn1 + b1, 0.0)
    return h1 @ ws2 + (a @ h1) @ wn2 + b2


def sage_reference_bf16(a, x, ws1, b1, wn1, ws2, b2, wn2):
    """Same numeric recipe as the kernel (bf16 MXU operands, f32 accumulation)."""
    bf, f32 = jnp.bfloat16, jnp.float32
    a_b, x_b = a.astype(bf), x.astype(bf)
    ax = jnp.dot(a_b, x_b, preferred_element_type=f32).astype(bf)
    h1 = jnp.maximum(
        jnp.dot(x_b, ws1.astype(bf), preferred_element_type=f32)
        + jnp.dot(ax, wn1.astype(bf), preferred_element_type=f32)
        + b1.astype(bf).astype(f32), 0.0)
    h1b = h1.astype(bf)
    ah1 = jnp.dot(a_b, h1b, preferred_element_type=f32).astype(bf)
    return (jnp.dot(h1b, ws2.astype(bf), preferred_element_type=f32)
            + jnp.dot(ah1, wn2.astype(bf), preferred_element_type=f32)
            + b2.astype(bf).astype(f32))


if __name__ == "__main__":
    # Small shapes consistent with the module: N nodes, in_size -> hid_size -> out_size.
    N, IN_SIZE, HID_SIZE, OUT_SIZE = 32, 8, 16, 8

    key = jax.random.PRNGKey(0)
    k_adj, k_x, k_ws1, k_wn1, k_b1, k_ws2, k_wn2, k_b2 = jax.random.split(key, 8)

    a_mean = build_mean_adjacency(k_adj, N)
    x = jax.random.normal(k_x, (N, IN_SIZE), dtype=jnp.float32)

    # SAGEConv params per layer: W_self [in, out], W_neigh [in, out], bias [out].
    ws1 = 0.1 * jax.random.normal(k_ws1, (IN_SIZE, HID_SIZE), dtype=jnp.float32)
    wn1 = 0.1 * jax.random.normal(k_wn1, (IN_SIZE, HID_SIZE), dtype=jnp.float32)
    b1 = 0.1 * jax.random.normal(k_b1, (HID_SIZE,), dtype=jnp.float32)
    ws2 = 0.1 * jax.random.normal(k_ws2, (HID_SIZE, OUT_SIZE), dtype=jnp.float32)
    wn2 = 0.1 * jax.random.normal(k_wn2, (HID_SIZE, OUT_SIZE), dtype=jnp.float32)
    b2 = 0.1 * jax.random.normal(k_b2, (OUT_SIZE,), dtype=jnp.float32)

    # One-time parameter padding / bias folding (hoisted out of the call path).
    w_fused = prepare_sage_params(ws1, b1, wn1, ws2, b2, wn2)

    out = sage_forward(a_mean, x, w_fused, in_size=IN_SIZE, out_size=OUT_SIZE)
    out = jax.block_until_ready(out)
    assert out.shape == (N, OUT_SIZE)

    # Tight check against the bf16-operand / f32-accumulate recipe the kernel uses.
    ref_bf16 = sage_reference_bf16(a_mean, x, ws1, b1, wn1, ws2, b2, wn2)
    err_bf16 = float(jnp.max(jnp.abs(out - ref_bf16)))
    assert jnp.allclose(out, ref_bf16, atol=1e-3, rtol=1e-3), err_bf16

    # Sanity check against the exact f32 module semantics (bf16 input rounding bound).
    ref_f32 = sage_reference_f32(a_mean, x, ws1, b1, wn1, ws2, b2, wn2)
    err_f32 = float(jnp.max(jnp.abs(out - ref_f32)))
    assert jnp.allclose(out, ref_f32, atol=2e-2, rtol=2e-2), err_f32

    # TODO(synk): pooling readouts (mean/max/sum), in/out linear, residual/LN/BN/JK
    # paths are disabled in the default config and left unimplemented.
    print("KERNEL_OK")
</pallas_src>

<mosaic_0001>
module attributes {stable_mosaic.version = 11 : i64} {
  func.func @sage_kernel(%arg0: memref<32x32xbf16, #tpu.memory_space<vmem>>, %arg1: memref<32x128xbf16, #tpu.memory_space<vmem>>, %arg2: memref<2x128x128xbf16, #tpu.memory_space<vmem>>, %arg3: memref<32x128xf32, #tpu.memory_space<vmem>>) attributes {dimension_semantics = [], scalar_prefetch = 0 : i64, scratch_operands = 0 : i64, tpu.core_type = #tpu.core_type<tc>} {
    %c0 = arith.constant 0 : index
    %c0_0 = arith.constant 0 : index
    %0 = vector.load %arg0[%c0, %c0_0] : memref<32x32xbf16, #tpu.memory_space<vmem>>, vector<32x32xbf16>
    %c0_1 = arith.constant 0 : index
    %c0_2 = arith.constant 0 : index
    %1 = vector.load %arg1[%c0_1, %c0_2] : memref<32x128xbf16, #tpu.memory_space<vmem>>, vector<32x128xbf16>
    %cst = arith.constant dense<0.000000e+00> : vector<32x128xf32>
    %2 = tpu.matmul %0, %1, %cst {dimension_numbers = #tpu.dot_dimension_numbers<[1], [0], [0], [1], [0, 0, 1, 1], [], []>} : vector<32x32xbf16>, vector<32x128xbf16>, vector<32x128xf32> -> vector<32x128xf32>
    %3 = arith.extf %1 : vector<32x128xbf16> to vector<32x128xf32>
    %c64_i32 = arith.constant 64 : i32
    %4 = tpu.dynamic_rotate %2 by %c64_i32 dim 1 : vector<32x128xf32>, i32 -> vector<32x128xf32>
    %5 = arith.addf %3, %4 : vector<32x128xf32>
    %6 = arith.truncf %5 : vector<32x128xf32> to vector<32x128xbf16>
    %c0_3 = arith.constant 0 : index
    %c0_4 = arith.constant 0 : index
    %c0_5 = arith.constant 0 : index
    %7 = vector.load %arg2[%c0_3, %c0_4, %c0_5] : memref<2x128x128xbf16, #tpu.memory_space<vmem>>, vector<1x128x128xbf16>
    %8 = vector.shape_cast %7 : vector<1x128x128xbf16> to vector<128x128xbf16>
    %cst_6 = arith.constant dense<0.000000e+00> : vector<32x128xf32>
    %9 = tpu.matmul %6, %8, %cst_6 {dimension_numbers = #tpu.dot_dimension_numbers<[1], [0], [0], [1], [0, 0, 1, 1], [], []>} : vector<32x128xbf16>, vector<128x128xbf16>, vector<32x128xf32> -> vector<32x128xf32>
    %cst_7 = arith.constant 0.000000e+00 : f32
    %10 = vector.broadcast %cst_7 : f32 to vector<32x128xf32>
    %11 = arith.maximumf %9, %10 : vector<32x128xf32>
    %12 = arith.truncf %11 : vector<32x128xf32> to vector<32x128xbf16>
    %cst_8 = arith.constant dense<0.000000e+00> : vector<32x128xf32>
    %13 = tpu.matmul %0, %12, %cst_8 {dimension_numbers = #tpu.dot_dimension_numbers<[1], [0], [0], [1], [0, 0, 1, 1], [], []>} : vector<32x32xbf16>, vector<32x128xbf16>, vector<32x128xf32> -> vector<32x128xf32>
    %c64_i32_9 = arith.constant 64 : i32
    %14 = tpu.dynamic_rotate %13 by %c64_i32_9 dim 1 : vector<32x128xf32>, i32 -> vector<32x128xf32>
    %15 = arith.addf %11, %14 : vector<32x128xf32>
    %16 = arith.truncf %15 : vector<32x128xf32> to vector<32x128xbf16>
    %c1 = arith.constant 1 : index
    %c0_10 = arith.constant 0 : index
    %c0_11 = arith.constant 0 : index
    %17 = vector.load %arg2[%c1, %c0_10, %c0_11] : memref<2x128x128xbf16, #tpu.memory_space<vmem>>, vector<1x128x128xbf16>
    %18 = vector.shape_cast %17 : vector<1x128x128xbf16> to vector<128x128xbf16>
    %cst_12 = arith.constant dense<0.000000e+00> : vector<32x128xf32>
    %19 = tpu.matmul %16, %18, %cst_12 {dimension_numbers = #tpu.dot_dimension_numbers<[1], [0], [0], [1], [0, 0, 1, 1], [], []>} : vector<32x128xbf16>, vector<128x128xbf16>, vector<32x128xf32> -> vector<32x128xf32>
    %c0_13 = arith.constant 0 : index
    %c0_14 = arith.constant 0 : index
    %20 = vector.load %arg3[%c0_13, %c0_14] : memref<32x128xf32, #tpu.memory_space<vmem>>, vector<32x128xf32>
    tpu.vector_store %arg3[%c0_13, %c0_14], %19 {strides = array<i32>} : memref<32x128xf32, #tpu.memory_space<vmem>>, vector<32x128xf32>,
    return
  }
}

</mosaic_0001>

<bundles_post_ra>
// kernel: sage_forward.1
= control target key start
LH: loop header
LB: loop body
LE: loop exit
PB: predicated region body
PF: predicated region fallthrough
CT: control target
= control target key end

     0   :  { %vm45_vm0 = vcmask 261120   ;;  %s559_s1 = inlined_call_operand.vmem [shape: bf16[32,128], index: 1, kind: input, shape index: {}]   ;;  %s560_s0 = inlined_call_operand.vmem [shape: bf16[32,32], index: 0, kind: input, shape index: {}]   ;;  %s561_s2 = inlined_call_operand.vmem [shape: bf16[2,128,128], index: 2, kind: input, shape index: {}]   ;;  %s562_s3 = inlined_call_operand.vmem [shape: f32[32,128], index: 3, kind: output, shape index: {}]  }
   0x1   :  { %v406_v0 = vld [vmem:[%s559_s1 + $0x8] sm:$0xff]  ;;  %v405_v1 = vld [vmem:[%s559_s1] sm:$0xff]  ;;  %v414_v4 = vld [vmem:[%s561_s2 + $0x38] sm:$0xff] }
   0x2   :  { %58 = vmatpush.bf16.msra.mxu0 %v406_v0  ;;  %v470_v2 = vld [vmem:[%s560_s0] sm:$0xff]  ;;  %v477_v3 = vld [vmem:[%s560_s0 + $0x8] sm:$0xff]  ;;  %v413_v5 = vld [vmem:[%s561_s2 + $0x30] sm:$0xff]  ;;  %423 = vmatpush.bf16.msra.mxu1 %v414_v4  ;;  %s440_s0 = smov 64  }
   0x3   :  { %v412_v6 = vld [vmem:[%s561_s2 + $0x28] sm:$0xff]  ;;  %v411_v8 = vld [vmem:[%s561_s2 + $0x20] sm:$0xff]  ;;  %v410_v9 = vld [vmem:[%s561_s2 + $0x18] sm:$0xff] }
   0x4   :  { %v409_v13 = vld [vmem:[%s561_s2 + $0x10] sm:$0xff]  ;;  %v408_v14 = vld [vmem:[%s561_s2 + $0x8] sm:$0xff]  ;;  %v407_v15 = vld [vmem:[%s561_s2] sm:$0xff] }
   0x5   :  { %v19_v17 = vld [vmem:[%s559_s1] sm:$0xff]   ;;  %v21_v25 = vld [vmem:[%s559_s1 + $0x8] sm:$0xff]   ;;  %v422_v42 = vld [vmem:[%s561_s2 + $0x78] sm:$0xff] }
   0x6   :  { %59 = vmatpush.bf16.msra.mxu0 %v405_v1  ;;  %424 = vmatpush.bf16.msra.mxu1 %v413_v5  ;;  %v71_v18 = vunpack.c.l.bf16 %v19_v17  ;;  %v72_v19 = vunpack.c.h.bf16 %v19_v17  ;;  %v73_v26 = vunpack.c.l.bf16 %v21_v25  ;;  %v74_v27 = vunpack.c.h.bf16 %v21_v25  ;;  %v421_v43 = vld [vmem:[%s561_s2 + $0x70] sm:$0xff]  ;;  %v420_v44 = vld [vmem:[%s561_s2 + $0x68] sm:$0xff]  ;;  %v419_v46 = vld [vmem:[%s561_s2 + $0x60] sm:$0xff] }
   0x7   :  { %431 = vmatpush.bf16.msra.mxu3 %v422_v42  ;;  %v418_v47 = vld [vmem:[%s561_s2 + $0x58] sm:$0xff]  ;;  %v417_v51 = vld [vmem:[%s561_s2 + $0x50] sm:$0xff]  ;;  %v416_v52 = vld [vmem:[%s561_s2 + $0x48] sm:$0xff] }
   0x8   :  { %v415_v53 = vld [vmem:[%s561_s2 + $0x40] sm:$0xff] }
   0x9   :  { %319 = vmatmul.msk.bf16.vlgmr.msra.gmra.mxu0 %vm45_vm0, %v470_v2 }
   0xa   :  { %153 = vmatpush.bf16.msrb.mxu0 %v414_v4  ;;  %425 = vmatpush.bf16.msra.mxu1 %v412_v6 }
   0xb   :  { %432 = vmatpush.bf16.msra.mxu3 %v421_v43 }
   0xe   :  { %154 = vmatpush.bf16.msrb.mxu0 %v413_v5  ;;  %426 = vmatpush.bf16.msra.mxu1 %v411_v8 }
   0xf   :  { %433 = vmatpush.bf16.msra.mxu3 %v420_v44 }
  0x12   :  { %155 = vmatpush.bf16.msrb.mxu0 %v412_v6  ;;  %427 = vmatpush.bf16.msra.mxu1 %v410_v9 }
  0x13   :  { %434 = vmatpush.bf16.msra.mxu3 %v419_v46 }
  0x16   :  { %156 = vmatpush.bf16.msrb.mxu0 %v411_v8  ;;  %428 = vmatpush.bf16.msra.mxu1 %v409_v13 }
  0x17   :  { %435 = vmatpush.bf16.msra.mxu3 %v418_v47 }
  0x19   :  { %320 = vmatmul.msk.bf16.gmra.mxu0 %vm45_vm0, %v477_v3 }
  0x1a   :  { %157 = vmatpush.bf16.msrb.mxu0 %v410_v9  ;;  %429 = vmatpush.bf16.msra.mxu1 %v408_v14 }
  0x1b   :  { %436 = vmatpush.bf16.msra.mxu3 %v417_v51 }
  0x1e   :  { %158 = vmatpush.bf16.msrb.mxu0 %v409_v13  ;;  %430 = vmatpush.bf16.msra.mxu1 %v407_v15 }
  0x1f   :  { %437 = vmatpush.bf16.msra.mxu3 %v416_v52 }
  0x22   :  { %159 = vmatpush.bf16.msrb.mxu0 %v408_v14 }
  0x23   :  { %438 = vmatpush.bf16.msra.mxu3 %v415_v53 }
  0x26   :  { %160 = vmatpush.bf16.msrb.mxu0 %v407_v15 }
  0x86   :  { %v61_v7 = vpop.f32.mrf.mxu0 }
  0x87   :  { %75 = vrot.lane.b32.xlu1 %v61_v7, %s440_s0 }
  0x8e   :  { %v63_v10 = vpop.f32.mrf.mxu0 }
  0x8f   :  { %77 = vrot.lane.b32.xlu1 %v63_v10, %s440_s0 }
  0x96   :  { %v66_v11 = vpop.f32.mrf.mxu0 }
  0x97   :  { %79 = vrot.lane.b32.xlu0 %v66_v11, %s440_s0 }
  0x9e   :  { %v68_v12 = vpop.f32.mrf.mxu0 }
  0x9f   :  { %81 = vrot.lane.b32.xlu0 %v68_v12, %s440_s0 }
  0xf9   :  { %v76_v16 = vpop.permute.xlu1 %75 }
  0xfa   :  { %v83_v21 = vadd.f32 %v76_v16, %v71_v18 }
 0x101   :  { %v78_v20 = vpop.permute.xlu1 %77 }
 0x102   :  { %v84_v22 = vadd.f32 %v78_v20, %v72_v19 }
 0x104   :  { %v87_v23 = vpack.c.bf16 %v84_v22, %v83_v21 }
 0x106   :  { %161 = vmatmul.bf16.vlgmr.msrb.gmra.mxu0 %v87_v23 }
 0x109   :  { %v80_v24 = vpop.permute.xlu0 %79 }
 0x10a   :  { %v85_v29 = vadd.f32 %v80_v24, %v73_v26 }
 0x111   :  { %v82_v28 = vpop.permute.xlu0 %81 }
 0x112   :  { %v86_v30 = vadd.f32 %v82_v28, %v74_v27 }
 0x114   :  { %v88_v31 = vpack.c.bf16 %v86_v30, %v85_v29 }
 0x116   :  { %166 = vmatmul.bf16.vlgmr.msra.gmra.mxu1 %v88_v31 }
 0x183   :  { %v162_v32 = vpop.f32.mrf.mxu0 }
 0x184   :  { %v172_v40 = vmax.f32 %v162_v32, 0.0 }
 0x18b   :  { %v164_v34 = vpop.f32.mrf.mxu0 }
 0x18c   :  { %v173_v38 = vmax.f32 %v164_v34, 0.0 }
 0x18e   :  { %v176_v41 = vpack.c.bf16 %v173_v38, %v172_v40 }
 0x193   :  { %v167_v33 = vpop.f32.mrf.mxu1 }
 0x194   :  { %v174_v36 = vmax.f32 %v167_v33, 0.0 }
 0x19b   :  { %v169_v35 = vpop.f32.mrf.mxu1 }
 0x19c   :  { %v175_v37 = vmax.f32 %v169_v35, 0.0 }
 0x19e   :  { %v177_v39 = vpack.c.bf16 %v175_v37, %v174_v36 }
 0x1a0   :  { %184 = vmatpush.bf16.msra.mxu2 %v177_v39 }
 0x1a4   :  { %185 = vmatpush.bf16.msra.mxu2 %v176_v41 }
 0x1a7   :  { %353 = vmatmul.msk.bf16.vlgmr.msra.gmra.mxu2 %vm45_vm0, %v470_v2 }
 0x1a8   :  { %276 = vmatpush.bf16.msrb.mxu2 %v422_v42 }
 0x1ac   :  { %277 = vmatpush.bf16.msrb.mxu2 %v421_v43 }
 0x1b0   :  { %278 = vmatpush.bf16.msrb.mxu2 %v420_v44 }
 0x1b4   :  { %279 = vmatpush.bf16.msrb.mxu2 %v419_v46 }
 0x1b7   :  { %354 = vmatmul.msk.bf16.gmra.mxu2 %vm45_vm0, %v477_v3 }
 0x1b8   :  { %280 = vmatpush.bf16.msrb.mxu2 %v418_v47 }
 0x1bc   :  { %281 = vmatpush.bf16.msrb.mxu2 %v417_v51 }
 0x1c0   :  { %282 = vmatpush.bf16.msrb.mxu2 %v416_v52 }
 0x1c4   :  { %283 = vmatpush.bf16.msrb.mxu2 %v415_v53 }
 0x22a   :  { %v187_v45 = vpop.f32.mrf.mxu2 }
 0x22b   :  { %197 = vrot.lane.b32.xlu2 %v187_v45, %s440_s0 }
 0x232   :  { %v189_v48 = vpop.f32.mrf.mxu2 }
 0x233   :  { %199 = vrot.lane.b32.xlu2 %v189_v48, %s440_s0 }
 0x23a   :  { %v192_v49 = vpop.f32.mrf.mxu2 }
 0x23b   :  { %201 = vrot.lane.b32.xlu0 %v192_v49, %s440_s0 }
 0x242   :  { %v194_v50 = vpop.f32.mrf.mxu2 }
 0x243   :  { %203 = vrot.lane.b32.xlu1 %v194_v50, %s440_s0 }
 0x285   :  { %v198_v54 = vpop.permute.xlu2 %197 }
 0x286   :  { %v205_v56 = vadd.f32 %v198_v54, %v172_v40 }
 0x28d   :  { %v200_v55 = vpop.permute.xlu2 %199 }
 0x28e   :  { %v206_v57 = vadd.f32 %v200_v55, %v173_v38 }
 0x290   :  { %v209_v58 = vpack.c.bf16 %v206_v57, %v205_v56 }
 0x292   :  { %284 = vmatmul.bf16.vlgmr.msrb.gmra.mxu2 %v209_v58 }
 0x2ad   :  { %v202_v59 = vpop.permute.xlu0 %201 }
 0x2ae   :  { %v207_v61 = vadd.f32 %v202_v59, %v174_v36 }
 0x2b5   :  { %v204_v60 = vpop.permute.xlu1 %203 }
 0x2b6   :  { %v208_v62 = vadd.f32 %v204_v60, %v175_v37 }
 0x2b8   :  { %v210_v63 = vpack.c.bf16 %v208_v62, %v207_v61 }
 0x2ba   :  { %289 = vmatmul.bf16.vlgmr.msra.gmra.mxu3 %v210_v63 }
 0x315   :  { %v285_v0 = vpop.f32.mrf.mxu2 }
 0x316   :  { %295 = vst [vmem:[%s562_s3] sm:$0xff] %v285_v0 }
 0x31d   :  { %v287_v1 = vpop.f32.mrf.mxu2 }
 0x31e   :  { %296 = vst [vmem:[%s562_s3 + $0x8] sm:$0xff] %v287_v1 }
 0x33d   :  { %v290_v2 = vpop.f32.mrf.mxu3 }
 0x33e   :  { %297 = vst [vmem:[%s562_s3 + $0x10] sm:$0xff] %v290_v2 }
 0x345   :  { %v292_v3 = vpop.f32.mrf.mxu3 }
 0x346   :  { %298 = vst [vmem:[%s562_s3 + $0x18] sm:$0xff] %v292_v3 }

</bundles_post_ra>
